<compile_context>
chip_gen: v7x
topology: tpu7x:2x2x1
jax: 0.10.0
libtpu: 0.0.40
codegen_flags: <defaults>
</compile_context>

<pallas_src>
import jax
import jax.numpy as jnp
import numpy as np
from jax.experimental import pallas as pl
from jax.experimental.pallas import tpu as pltpu


def _modulation_kernel(x_ref, w_ref, b_ref, o_ref):
    # out_tile = x_tile @ w_tile + b_tile
    # Cast activations to the weight dtype (bf16 on the perf path) so the MXU
    # sees its native input type; accumulate in f32; bias add in f32.
    acc = jnp.dot(x_ref[...].astype(w_ref.dtype), w_ref[...],
                  preferred_element_type=jnp.float32)
    o_ref[...] = (acc + b_ref[...].astype(jnp.float32)).astype(o_ref.dtype)


def _pick_tile(extent, target, granularity):
    """Largest tile <= target that divides `extent` and is a multiple of
    `granularity`; falls back to the full extent (always a legal block)."""
    if extent <= target or extent % granularity != 0:
        return extent
    cand = (target // granularity) * granularity
    while cand >= granularity:
        if extent % cand == 0:
            return cand
        cand -= granularity
    return extent


def modulation_forward(x, w_fused, b_fused, n_adain_layers, adain_dim,
                       *, block_m=256, block_n=512):
    """Fused Modulation forward.

    x:        (B, code_dim)      activations (f32)
    w_fused:  (code_dim, L*D*2)  stacked per-layer Linear weights (W_l.T), f32 or bf16
    b_fused:  (1, L*D*2)         stacked per-layer biases (f32)
    Returns   (B, L, D, 2), matching the PyTorch module's output.
    """
    B, K = x.shape
    n_out = n_adain_layers * adain_dim * 2
    assert w_fused.shape == (K, n_out)
    assert b_fused.shape == (1, n_out)

    # Lane-dense tiles along the fused-output axis (and batch, if it is big
    # enough).  Tiles must be (8,128)-divisible or equal the full extent.
    tn = _pick_tile(n_out, block_n, 128)
    tm = _pick_tile(B, block_m, 8)
    grid = (B // tm, n_out // tn)

    # Deeper buffering on the streamed weight once there are enough N tiles
    # for it to help hide per-tile DMA latency.
    if grid[1] >= 3:
        w_spec = pl.BlockSpec((K, tn), lambda i, j: (0, j),
                              pipeline_mode=pl.Buffered(3))
    else:
        w_spec = pl.BlockSpec((K, tn), lambda i, j: (0, j))

    cost = pl.CostEstimate(
        flops=2 * B * K * n_out,
        transcendentals=0,
        bytes_accessed=(x.size * x.dtype.itemsize
                        + w_fused.size * w_fused.dtype.itemsize
                        + b_fused.size * b_fused.dtype.itemsize
                        + B * n_out * 4),
    )

    out = pl.pallas_call(
        _modulation_kernel,
        out_shape=jax.ShapeDtypeStruct((B, n_out), jnp.float32),
        grid_spec=pl.GridSpec(
            grid=grid,
            in_specs=[
                pl.BlockSpec((tm, K), lambda i, j: (i, 0)),   # x: reused per N tile
                w_spec,                                        # W: streamed over N
                pl.BlockSpec((1, tn), lambda i, j: (0, j)),    # bias: per N tile
            ],
            out_specs=pl.BlockSpec((tm, tn), lambda i, j: (i, j)),
        ),
        compiler_params=pltpu.CompilerParams(
            dimension_semantics=("parallel", "parallel"),
        ),
        cost_estimate=cost,
    )(x, w_fused, b_fused)

    # Reshape glue: (B, L*D*2) -> (B, L, D, 2), identical to torch .reshape.
    return out.reshape(B, n_adain_layers, adain_dim, 2)


def init_modulation_params(key, code_dim, n_adain_layers, adain_dim):
    """Deterministic init mimicking nn.Linear (uniform +/- 1/sqrt(in_features)).

    Per-layer PyTorch weight W_l has shape (out=D*2, in=code_dim) and computes
    x @ W_l.T + b_l.  We stack the transposed weights along the output axis so
    a single matmul reproduces the concatenation along dim=-1.
    """
    bound = 1.0 / np.sqrt(code_dim)
    kw, kb = jax.random.split(key)
    # (L, code_dim, D*2) == per-layer W_l.T stacked
    w = jax.random.uniform(
        kw, (n_adain_layers, code_dim, adain_dim * 2),
        minval=-bound, maxval=bound, dtype=jnp.float32)
    b = jax.random.uniform(
        kb, (n_adain_layers, adain_dim * 2),
        minval=-bound, maxval=bound, dtype=jnp.float32)
    # Fuse: concat along the output-feature axis -> (code_dim, L*D*2)
    w_fused = jnp.concatenate([w[l] for l in range(n_adain_layers)], axis=1)
    b_fused = jnp.concatenate([b[l] for l in range(n_adain_layers)], axis=0)[None, :]
    return w, b, w_fused, b_fused


if __name__ == "__main__":
    # --- small shapes consistent with the module ---
    B, code_dim, n_adain_layers, adain_dim = 2, 32, 4, 16   # n_out = 128
    key = jax.random.PRNGKey(0)
    kx, kp = jax.random.split(key)
    x = jax.random.normal(kx, (B, code_dim), dtype=jnp.float32)
    w, b, w_fused, b_fused = init_modulation_params(
        kp, code_dim, n_adain_layers, adain_dim)

    out = modulation_forward(x, w_fused, b_fused, n_adain_layers, adain_dim)
    out = jax.block_until_ready(out)

    # Pure-JAX reference of the PyTorch forward (per-layer linear + cat + reshape).
    ref = jnp.concatenate(
        [x @ w[l] + b[l] for l in range(n_adain_layers)], axis=-1
    ).reshape(B, n_adain_layers, adain_dim, 2)
    assert out.shape == (B, n_adain_layers, adain_dim, 2)
    np.testing.assert_allclose(np.asarray(out), np.asarray(ref),
                               rtol=1e-5, atol=1e-5)

    # --- bf16 weight path (halves HBM weight traffic; f32 accumulate) ---
    out_bf16 = modulation_forward(x, w_fused.astype(jnp.bfloat16), b_fused,
                                  n_adain_layers, adain_dim)
    out_bf16 = jax.block_until_ready(out_bf16)
    np.testing.assert_allclose(np.asarray(out_bf16), np.asarray(ref),
                               rtol=5e-2, atol=5e-2)

    # --- modestly larger shapes to exercise the tiled / multi-buffered path ---
    B2, cd2, L2, D2 = 8, 64, 4, 256    # n_out = 2048 -> 4 N tiles of 512
    kx2, kp2 = jax.random.split(jax.random.PRNGKey(1))
    x2 = jax.random.normal(kx2, (B2, cd2), dtype=jnp.float32)
    w2, b2, w2f, b2f = init_modulation_params(kp2, cd2, L2, D2)
    out2 = modulation_forward(x2, w2f, b2f, L2, D2)
    out2 = jax.block_until_ready(out2)
    ref2 = jnp.concatenate(
        [x2 @ w2[l] + b2[l] for l in range(L2)], axis=-1
    ).reshape(B2, L2, D2, 2)
    np.testing.assert_allclose(np.asarray(out2), np.asarray(ref2),
                               rtol=1e-5, atol=1e-5)

    print("KERNEL_OK")
</pallas_src>

<mosaic_0001>
module attributes {stable_mosaic.version = 11 : i64} {
  func.func @_modulation_kernel(%arg0: i32, %arg1: i32, %arg2: memref<2x32xf32, #tpu.memory_space<vmem>>, %arg3: memref<32x128xf32, #tpu.memory_space<vmem>>, %arg4: memref<1x128xf32, #tpu.memory_space<vmem>>, %arg5: memref<2x128xf32, #tpu.memory_space<vmem>>) attributes {dimension_semantics = [#tpu.dimension_semantics<parallel>, #tpu.dimension_semantics<parallel>], iteration_bounds = array<i64: 1, 1>, scalar_prefetch = 0 : i64, scratch_operands = 0 : i64, tpu.core_type = #tpu.core_type<tc>, window_params = [{transform_indices = @transform_0, window_bounds = array<i64: 2, 32>}, {transform_indices = @transform_1, window_bounds = array<i64: 32, 128>}, {transform_indices = @transform_2, window_bounds = array<i64: 1, 128>}, {transform_indices = @transform_3, window_bounds = array<i64: 2, 128>}]} {
    %c0 = arith.constant 0 : index
    %c0_0 = arith.constant 0 : index
    %0 = vector.load %arg2[%c0, %c0_0] : memref<2x32xf32, #tpu.memory_space<vmem>>, vector<2x32xf32>
    %c0_1 = arith.constant 0 : index
    %c0_2 = arith.constant 0 : index
    %1 = vector.load %arg3[%c0_1, %c0_2] : memref<32x128xf32, #tpu.memory_space<vmem>>, vector<32x128xf32>
    %cst = arith.constant dense<0.000000e+00> : vector<2x128xf32>
    %2 = tpu.matmul %0, %1, %cst {dimension_numbers = #tpu.dot_dimension_numbers<[1], [0], [0], [1], [0, 0, 1, 1], [], []>} : vector<2x32xf32>, vector<32x128xf32>, vector<2x128xf32> -> vector<2x128xf32>
    %c0_3 = arith.constant 0 : index
    %c0_4 = arith.constant 0 : index
    %3 = vector.load %arg4[%c0_3, %c0_4] : memref<1x128xf32, #tpu.memory_space<vmem>>, vector<1x128xf32>
    %4 = vector.broadcast %3 : vector<1x128xf32> to vector<2x128xf32>
    %5 = arith.addf %2, %4 : vector<2x128xf32>
    %c0_5 = arith.constant 0 : index
    %c0_6 = arith.constant 0 : index
    %6 = vector.load %arg5[%c0_5, %c0_6] : memref<2x128xf32, #tpu.memory_space<vmem>>, vector<2x128xf32>
    tpu.vector_store %arg5[%c0_5, %c0_6], %5 {strides = array<i32>} : memref<2x128xf32, #tpu.memory_space<vmem>>, vector<2x128xf32>,
    return
  }
  func.func @transform_0(%arg0: i32, %arg1: i32) -> (i32, i32) {
    %c0_i32 = arith.constant 0 : i32
    %c0_i32_0 = arith.constant 0 : i32
    return %arg0, %c0_i32 : i32, i32
  }
  func.func @transform_1(%arg0: i32, %arg1: i32) -> (i32, i32) {
    %c0_i32 = arith.constant 0 : i32
    %c0_i32_0 = arith.constant 0 : i32
    return %c0_i32, %arg1 : i32, i32
  }
  func.func @transform_2(%arg0: i32, %arg1: i32) -> (i32, i32) {
    %c0_i32 = arith.constant 0 : i32
    %c0_i32_0 = arith.constant 0 : i32
    return %c0_i32, %arg1 : i32, i32
  }
  func.func @transform_3(%arg0: i32, %arg1: i32) -> (i32, i32) {
    %c0_i32 = arith.constant 0 : i32
    return %arg0, %arg1 : i32, i32
  }
}

</mosaic_0001>

<bundles_post_ra>
// kernel: tpu_custom_call.1
= control target key start
LH: loop header
LB: loop body
LE: loop exit
PB: predicated region body
PF: predicated region fallthrough
CT: control target
= control target key end

     0   :  { %8 = vsyncpa [#allocation3], 0  ;;  %s322_s0 = inlined_call_operand.hbm [shape: f32[2,32], index: 0, kind: input, shape index: {}]   ;;  %s323_s1 = inlined_call_operand.hbm [shape: f32[32,128], index: 1, kind: input, shape index: {}]   ;;  %s324_s2 = inlined_call_operand.vmem [shape: f32[1,128], index: 2, kind: input, shape index: {}]   ;;  %s325_s3 = inlined_call_operand.hbm [shape: f32[2,128], index: 3, kind: output, shape index: {}]  }
   0x1   :  { %9 = vsyncpa [#allocation6], 0 }
   0x2   :  { %10 = vsyncpa [#allocation4], 0  ;;  %s248_s12 = smov [#allocation2]   ;;  %s249_s14 = smov [#allocation5]  }
   0x3   :  { %s17_s13 = sshll.u32 %s248_s12, 4  ;;  %s26_s15 = sshll.u32 %s249_s14, 4  ;;  %s18_s13 = int_to_ptr.vmem [resolvable:$true] %s17_s13  ;;  %s276_s15 = int_to_ptr.vmem [resolvable:$true] %s26_s15 }
   0x4   :  { %s176_s18 = scalar_lea.hbm %s322_s0, 32 }
   0x5   :  { %p177_p0 = scmp.ne.s32.totalorder %s322_s0, %s176_s18  ;;  %p180_p1 = scmp.lt.u32.totalorder %s176_s18, %s322_s0 }
   0x7   :  { %p182_p2 = pnand %p180_p1, %p177_p0 }
   0x9   :  { %185 = shalt.err (!%p182_p2)
}
   0xa   :  { %s186_s23 = scalar_lea.vmem %s18_s13, 32  ;;  %p191_p4 = scmp.lt.s32.totalorder %s18_s13, %s18_s13 }
   0xb   :  { %p187_p3 = scmp.ne.s32.totalorder %s18_s13, %s186_s23  ;;  %p192_p5 = scmp.lt.s32.totalorder %s186_s23, %s186_s23 }
   0xd   :  { %p193_p6 = por %p192_p5, %p191_p4 }
   0xf   :  { %p194_p7 = pnand %p193_p6, %p187_p3 }
  0x11   :  { %197 = shalt.err (!%p194_p7)
}
  0x12   :  { %20 = dma.hbm_to_vmem [thread:$0]  %s322_s0, 32, %s18_s13, [#allocation3]  }
  0x13   :  { %s198_s28 = scalar_lea.hbm %s323_s1, 512 }
  0x14   :  { %p199_p8 = scmp.ne.s32.totalorder %s323_s1, %s198_s28  ;;  %p202_p9 = scmp.lt.u32.totalorder %s198_s28, %s323_s1 }
  0x16   :  { %p204_p10 = pnand %p202_p9, %p199_p8 }
  0x18   :  { %207 = shalt.err (!%p204_p10)
}
  0x19   :  { %s208_s6 = scalar_lea.vmem %s276_s15, 512  ;;  %p213_p12 = scmp.lt.s32.totalorder %s276_s15, %s276_s15 }
  0x1a   :  { %p209_p11 = scmp.ne.s32.totalorder %s276_s15, %s208_s6  ;;  %p214_p13 = scmp.lt.s32.totalorder %s208_s6, %s208_s6 }
  0x1c   :  { %p215_p0 = por %p214_p13, %p213_p12 }
  0x1e   :  { %p216_p1 = pnand %p215_p0, %p209_p11 }
  0x20   :  { %219 = shalt.err (!%p216_p1)
}
  0x21   :  { %s250_s0 = smov 128   ;;  %s251_s7 = smov 8  }
  0x22   :  { %32 = dma.hbm_to_vmem [thread:$0]  %s323_s1, 512, %s276_s15, [#allocation6], %s250_s0, %s250_s0, %s251_s7  }
  0x23   :  { %242 = dma.done.wait [#allocation3], 32  }
  0x24   :  { %243 = vsyncadd [#allocation3], 4294967264 }
  0x25   :  { %244 = dma.done.wait [#allocation6], 512  }
  0x26   :  { %245 = vsyncadd [#allocation6], 4294966784  ;;  %v252_v0 = vmov 0.0|0.0   ;;  %vm253_vm0 = vmmov 0   ;;  %v254_v1 = vmov 0.0   ;;  %v42_v2 = vld [vmem:[#allocation5] sm:$0xff] }
  0x27   :  { %162 = vmatprep.subr.bf16.mxu0 %v252_v0  ;;  %159 = vmatprep.mubr.msk.f32.mxu0 %vm253_vm0, %v254_v1  ;;  %v43_v3 = vld [vmem:[#allocation5 + $0x8] sm:$0xff]  ;;  %v44_v4 = vld [vmem:[#allocation5 + $0x10] sm:$0xff]  ;;  %v45_v6 = vld [vmem:[#allocation5 + $0x18] sm:$0xff]  ;;  %vm53_vm1 = vcmask 261120   ;;  %s255_s11 = smov [#allocation7]  }
  0x28   :  { %v163_v5 = vpack.c.bf16 %v43_v3, %v42_v2  ;;  %v166_v7 = vpack.c.bf16 %v45_v6, %v44_v4  ;;  %v41_v8 = vld [vmem:[#allocation2] sm:$0x3]  ;;  %s134_s12 = sshll.u32 %s255_s11, 4  ;;  %s135_s12 = int_to_ptr.vmem [resolvable:$true] %s134_s12 }
  0x29   :  { %v144_v9 = vld [vmem:[%s324_s2] ss:$0 sm:$0xff]  ;;  %s220_s13 = scalar_lea.vmem %s135_s12, 32  ;;  %p225_p3 = scmp.lt.s32.totalorder %s135_s12, %s135_s12 }
  0x2a   :  { %164 = vmatpush3.bf16.msra.mxu0 %v163_v5  ;;  %p221_p2 = scmp.ne.s32.totalorder %s135_s12, %s220_s13  ;;  %p226_p4 = scmp.lt.s32.totalorder %s220_s13, %s220_s13 }
  0x2b   :  { %165 = vmatprep.subr.bf16.mxu0 %v252_v0 }
  0x2c   :  { %p227_p5 = por %p226_p4, %p225_p3 }
  0x2e   :  { %167 = vmatpush3.bf16.msra.mxu0 %v166_v7  ;;  %p228_p6 = pnand %p227_p5, %p221_p2 }
  0x31   :  { %160 = vmatmul.mubr.msk.f32.vlgmr.msra.gmra.mrb[0].mxu0 %vm53_vm1, %v41_v8 }
 0x104   :  { %v123_v10 = vpop.f32.mrb[0].mxu0 }
 0x105   :  { %v124_v11 = vadd.f32 %v144_v9, %v123_v10  ;;  %v161_v12 = vpop.f32.mrb[1].mxu0 }
 0x107   :  { %127 = vst [vmem:[#allocation7] sm:$0x3] %v124_v11 }
 0x108   :  { %231 = shalt.err (!%p228_p6)
}
 0x109   :  { %s232_s16 = scalar_lea.hbm %s325_s3, 32 }
 0x10a   :  { %p233_p7 = scmp.ne.s32.totalorder %s325_s3, %s232_s16  ;;  %p236_p8 = scmp.lt.u32.totalorder %s232_s16, %s325_s3 }
 0x10c   :  { %p238_p9 = pnand %p236_p8, %p233_p7 }
 0x10e   :  { %241 = shalt.err (!%p238_p9)
}
 0x10f   :  { %137 = dma.vmem_to_hbm [thread:$0]  %s135_s12, 32, %s325_s3, [#allocation4]  }
 0x110   :  { %246 = dma.done.wait [#allocation4], 32  }
 0x111   :  { %247 = vsyncadd [#allocation4], 4294967264 }
 0x112   :  { %141 = vsyncpa [#allocation3], 1 }
 0x113   :  { %142 = vsyncpa [#allocation6], 1 }
 0x114   :  { %143 = vsyncpa [#allocation4], 1 }

</bundles_post_ra>
